<compile_context>
chip_gen: v6e
topology: v6e:2x2x1
jax: 0.10.0
libtpu: 0.0.40
codegen_flags: <defaults>
</compile_context>

<pallas_src>
import functools

import jax
import jax.numpy as jnp
from jax.experimental import pallas as pl
from jax.experimental.pallas import tpu as pltpu


def _round_up(x, m):
    return (x + m - 1) // m * m


def _actor_kernel(x_ref, w_ref, p_ref, out_ref, *, use_ln, fc1_dims, fc2_dims):
    # x_ref : (Bp, P) f32      zero-padded state
    # w_ref : (3, P, P) f32    [fc1, fc2, mu] weights, stored (in, out), zero-padded
    # p_ref : (8, P) f32       rows: b1, b2, b3, g1, be1, g2, be2, (unused)
    x = x_ref[...]

    b1 = p_ref[0:1, :]
    b2 = p_ref[1:2, :]
    b3 = p_ref[2:3, :]
    g1 = p_ref[3:4, :]
    be1 = p_ref[4:5, :]
    g2 = p_ref[5:6, :]
    be2 = p_ref[6:7, :]

    def layer_norm(a, gamma, beta, n_valid):
        # Single-pass statistics: padded lanes of `a` are exactly 0, so summing
        # over the full padded width and dividing by the true feature count is
        # exact. Padded lanes of gamma/beta are 0, so padded output stays 0.
        inv_n = 1.0 / float(n_valid)
        s = jnp.sum(a, axis=-1, keepdims=True)
        ss = jnp.sum(a * a, axis=-1, keepdims=True)
        mean = s * inv_n
        var = jnp.maximum(ss * inv_n - mean * mean, 0.0)
        return (a - mean) * jax.lax.rsqrt(var + 1e-5) * gamma + beta

    # fc1 -> ReLU -> [LN1]
    a = jnp.dot(x, w_ref[0], preferred_element_type=jnp.float32) + b1
    a = jnp.maximum(a, 0.0)
    if use_ln:
        a = layer_norm(a, g1, be1, fc1_dims)

    # fc2 -> ReLU -> [LN2]
    a = jnp.dot(a, w_ref[1], preferred_element_type=jnp.float32) + b2
    a = jnp.maximum(a, 0.0)
    if use_ln:
        a = layer_norm(a, g2, be2, fc2_dims)

    # mu -> tanh
    mu = jnp.dot(a, w_ref[2], preferred_element_type=jnp.float32) + b3
    out_ref[...] = jnp.tanh(mu).astype(out_ref.dtype)


@functools.partial(jax.jit,
                   static_argnames=("use_ln", "fc1_dims", "fc2_dims", "n_actions"))
def actor_forward(state, packed, *, use_ln, fc1_dims, fc2_dims, n_actions):
    """ActorNetwork.forward via a single Pallas TPU kernel (3 input DMAs)."""
    w_slab = packed["w"]          # (3, P, P)
    p_slab = packed["p"]          # (8, P)
    P = w_slab.shape[-1]

    B, d_in = state.shape
    Bp = _round_up(B, 8)

    # Zero-pad state to a lane-dense, sublane-aligned (Bp, P) tile.
    x = jnp.zeros((Bp, P), jnp.float32).at[:B, :d_in].set(state.astype(jnp.float32))

    kernel = functools.partial(_actor_kernel, use_ln=use_ln,
                               fc1_dims=fc1_dims, fc2_dims=fc2_dims)
    vmem = pl.BlockSpec(memory_space=pltpu.MemorySpace.VMEM)

    out = pl.pallas_call(
        kernel,
        out_shape=jax.ShapeDtypeStruct((Bp, P), jnp.float32),  # lane-dense output
        in_specs=[vmem, vmem, vmem],
        out_specs=vmem,
    )(x, w_slab, p_slab)

    return out[:B, :n_actions]


def init_actor_params(key, input_dim, fc1_dims, fc2_dims, n_actions):
    """PyTorch nn.Linear defaults: U(-1/sqrt(fan_in), 1/sqrt(fan_in)) for W and b.
    Weights stored transposed relative to PyTorch: (in_features, out_features)."""
    keys = jax.random.split(key, 6)

    def linear(kw, kb, fan_in, fan_out):
        bound = 1.0 / jnp.sqrt(float(fan_in))
        w = jax.random.uniform(kw, (fan_in, fan_out), jnp.float32, -bound, bound)
        b = jax.random.uniform(kb, (fan_out,), jnp.float32, -bound, bound)
        return w, b

    w1, b1 = linear(keys[0], keys[1], input_dim, fc1_dims)
    w2, b2 = linear(keys[2], keys[3], fc1_dims, fc2_dims)
    w3, b3 = linear(keys[4], keys[5], fc2_dims, n_actions)

    # LayerNorm affine params (PyTorch init: weight=1, bias=0)
    g1 = jnp.ones((fc1_dims,), jnp.float32)
    be1 = jnp.zeros((fc1_dims,), jnp.float32)
    g2 = jnp.ones((fc2_dims,), jnp.float32)
    be2 = jnp.zeros((fc2_dims,), jnp.float32)

    return dict(w1=w1, b1=b1, w2=w2, b2=b2, w3=w3, b3=b3,
                g1=g1, be1=be1, g2=g2, be2=be2)


def pack_actor_params(params, input_dim, fc1_dims, fc2_dims, n_actions):
    """Pack all parameters into two zero-padded slabs (done once, off the hot path):
       w-slab (3, P, P)  and  param-slab (8, P)."""
    P = _round_up(max(input_dim, fc1_dims, fc2_dims, n_actions), 128)

    w = jnp.zeros((3, P, P), jnp.float32)
    w = w.at[0, :input_dim, :fc1_dims].set(params["w1"])
    w = w.at[1, :fc1_dims, :fc2_dims].set(params["w2"])
    w = w.at[2, :fc2_dims, :n_actions].set(params["w3"])

    p = jnp.zeros((8, P), jnp.float32)
    p = p.at[0, :fc1_dims].set(params["b1"])
    p = p.at[1, :fc2_dims].set(params["b2"])
    p = p.at[2, :n_actions].set(params["b3"])
    p = p.at[3, :fc1_dims].set(params["g1"])
    p = p.at[4, :fc1_dims].set(params["be1"])
    p = p.at[5, :fc2_dims].set(params["g2"])
    p = p.at[6, :fc2_dims].set(params["be2"])

    return dict(w=w, p=p)


def actor_forward_ref(state, p, *, use_ln):
    """Pure-JAX reference of the PyTorch forward pass (two-pass LayerNorm)."""
    a = jnp.maximum(state @ p["w1"] + p["b1"][None, :], 0.0)
    if use_ln:
        m = jnp.mean(a, -1, keepdims=True)
        v = jnp.mean(jnp.square(a - m), -1, keepdims=True)
        a = (a - m) * jax.lax.rsqrt(v + 1e-5) * p["g1"][None, :] + p["be1"][None, :]
    a = jnp.maximum(a @ p["w2"] + p["b2"][None, :], 0.0)
    if use_ln:
        m = jnp.mean(a, -1, keepdims=True)
        v = jnp.mean(jnp.square(a - m), -1, keepdims=True)
        a = (a - m) * jax.lax.rsqrt(v + 1e-5) * p["g2"][None, :] + p["be2"][None, :]
    return jnp.tanh(a @ p["w3"] + p["b3"][None, :])


if __name__ == "__main__":
    # Pendulum-like sizes: state dim 3, hidden 32/32, 1 action.
    B, INPUT_DIM, FC1, FC2, N_ACTIONS = 4, 3, 32, 32, 1

    key = jax.random.PRNGKey(0)
    k_state, k_params = jax.random.split(key)

    state = jax.random.normal(k_state, (B, INPUT_DIM), jnp.float32)
    params = init_actor_params(k_params, INPUT_DIM, FC1, FC2, N_ACTIONS)
    packed = pack_actor_params(params, INPUT_DIM, FC1, FC2, N_ACTIONS)

    for use_ln in (False, True):  # exercise both ln=False and ln=True paths
        out = actor_forward(state, packed, use_ln=use_ln,
                            fc1_dims=FC1, fc2_dims=FC2, n_actions=N_ACTIONS)
        out = jax.block_until_ready(out)
        ref = actor_forward_ref(state, params, use_ln=use_ln)
        assert out.shape == (B, N_ACTIONS)
        assert jnp.allclose(out, ref, atol=1e-5, rtol=1e-5), (out, ref)

    print("KERNEL_OK")
</pallas_src>

<mosaic_0001>
module attributes {stable_mosaic.version = 11 : i64} {
  func.func @_actor_kernel(%arg0: memref<8x128xf32, #tpu.memory_space<vmem>>, %arg1: memref<3x128x128xf32, #tpu.memory_space<vmem>>, %arg2: memref<8x128xf32, #tpu.memory_space<vmem>>, %arg3: memref<8x128xf32, #tpu.memory_space<vmem>>) attributes {dimension_semantics = [], scalar_prefetch = 0 : i64, scratch_operands = 0 : i64, tpu.core_type = #tpu.core_type<tc>} {
    %c0 = arith.constant 0 : index
    %c0_0 = arith.constant 0 : index
    %0 = vector.load %arg0[%c0, %c0_0] : memref<8x128xf32, #tpu.memory_space<vmem>>, vector<8x128xf32>
    %c0_1 = arith.constant 0 : index
    %c0_2 = arith.constant 0 : index
    %1 = vector.load %arg2[%c0_1, %c0_2] : memref<8x128xf32, #tpu.memory_space<vmem>>, vector<1x128xf32>
    %c1 = arith.constant 1 : index
    %c0_3 = arith.constant 0 : index
    %2 = vector.load %arg2[%c1, %c0_3] : memref<8x128xf32, #tpu.memory_space<vmem>>, vector<1x128xf32>
    %c2 = arith.constant 2 : index
    %c0_4 = arith.constant 0 : index
    %3 = vector.load %arg2[%c2, %c0_4] : memref<8x128xf32, #tpu.memory_space<vmem>>, vector<1x128xf32>
    %c0_5 = arith.constant 0 : index
    %c0_6 = arith.constant 0 : index
    %c0_7 = arith.constant 0 : index
    %4 = vector.load %arg1[%c0_5, %c0_6, %c0_7] : memref<3x128x128xf32, #tpu.memory_space<vmem>>, vector<1x128x128xf32>
    %5 = vector.shape_cast %4 : vector<1x128x128xf32> to vector<128x128xf32>
    %cst = arith.constant dense<0.000000e+00> : vector<8x128xf32>
    %6 = tpu.matmul %0, %5, %cst {dimension_numbers = #tpu.dot_dimension_numbers<[1], [0], [0], [1], [0, 0, 1, 1], [], []>} : vector<8x128xf32>, vector<128x128xf32>, vector<8x128xf32> -> vector<8x128xf32>
    %7 = vector.broadcast %1 : vector<1x128xf32> to vector<8x128xf32>
    %8 = arith.addf %6, %7 : vector<8x128xf32>
    %cst_8 = arith.constant 0.000000e+00 : f32
    %9 = vector.broadcast %cst_8 : f32 to vector<8x128xf32>
    %10 = arith.maximumf %8, %9 : vector<8x128xf32>
    %c1_9 = arith.constant 1 : index
    %c0_10 = arith.constant 0 : index
    %c0_11 = arith.constant 0 : index
    %11 = vector.load %arg1[%c1_9, %c0_10, %c0_11] : memref<3x128x128xf32, #tpu.memory_space<vmem>>, vector<1x128x128xf32>
    %12 = vector.shape_cast %11 : vector<1x128x128xf32> to vector<128x128xf32>
    %cst_12 = arith.constant dense<0.000000e+00> : vector<8x128xf32>
    %13 = tpu.matmul %10, %12, %cst_12 {dimension_numbers = #tpu.dot_dimension_numbers<[1], [0], [0], [1], [0, 0, 1, 1], [], []>} : vector<8x128xf32>, vector<128x128xf32>, vector<8x128xf32> -> vector<8x128xf32>
    %14 = vector.broadcast %2 : vector<1x128xf32> to vector<8x128xf32>
    %15 = arith.addf %13, %14 : vector<8x128xf32>
    %cst_13 = arith.constant 0.000000e+00 : f32
    %16 = vector.broadcast %cst_13 : f32 to vector<8x128xf32>
    %17 = arith.maximumf %15, %16 : vector<8x128xf32>
    %c2_14 = arith.constant 2 : index
    %c0_15 = arith.constant 0 : index
    %c0_16 = arith.constant 0 : index
    %18 = vector.load %arg1[%c2_14, %c0_15, %c0_16] : memref<3x128x128xf32, #tpu.memory_space<vmem>>, vector<1x128x128xf32>
    %19 = vector.shape_cast %18 : vector<1x128x128xf32> to vector<128x128xf32>
    %cst_17 = arith.constant dense<0.000000e+00> : vector<8x128xf32>
    %20 = tpu.matmul %17, %19, %cst_17 {dimension_numbers = #tpu.dot_dimension_numbers<[1], [0], [0], [1], [0, 0, 1, 1], [], []>} : vector<8x128xf32>, vector<128x128xf32>, vector<8x128xf32> -> vector<8x128xf32>
    %21 = vector.broadcast %3 : vector<1x128xf32> to vector<8x128xf32>
    %22 = arith.addf %20, %21 : vector<8x128xf32>
    %23 = math.tanh %22 : vector<8x128xf32>
    %c0_18 = arith.constant 0 : index
    %c0_19 = arith.constant 0 : index
    %24 = vector.load %arg3[%c0_18, %c0_19] : memref<8x128xf32, #tpu.memory_space<vmem>>, vector<8x128xf32>
    tpu.vector_store %arg3[%c0_18, %c0_19], %23 {strides = array<i32>} : memref<8x128xf32, #tpu.memory_space<vmem>>, vector<8x128xf32>,
    return
  }
}

</mosaic_0001>

<bundles_post_ra>
// kernel: actor_forward.1
= control target key start
LH: loop header
LB: loop body
LE: loop exit
PB: predicated region body
PF: predicated region fallthrough
CT: control target
= control target key end

     0   :  { %8 = vsyncpa [#allocation3], 0  ;;  %s501_s12 = smov [#allocation2]   ;;  %s598_s0 = inlined_call_operand.vmem [shape: f32[8,128], index: 0, kind: input, shape index: {}]   ;;  %s599_s1 = inlined_call_operand.hbm [shape: f32[3,128,128], index: 1, kind: input, shape index: {}]   ;;  %s600_s2 = inlined_call_operand.vmem [shape: f32[8,128], index: 2, kind: input, shape index: {}]   ;;  %s601_s3 = inlined_call_operand.vmem [shape: f32[8,128], index: 3, kind: output, shape index: {}]  }
   0x1   :  { %s16_s13 = sshll.u32 %s501_s12, 4  ;;  %s17_s13 = int_to_ptr.vmem [resolvable:$true] %s16_s13 }
   0x2   :  { %s487_s14 = scalar_lea.vmem %s17_s13, 6144  ;;  %p492_p1 = scmp.lt.s32.totalorder %s17_s13, %s17_s13 }
   0x3   :  { %p488_p0 = scmp.ne.s32.totalorder %s17_s13, %s487_s14  ;;  %p493_p2 = scmp.lt.s32.totalorder %s487_s14, %s487_s14 }
   0x5   :  { %p494_p3 = por %p493_p2, %p492_p1 }
   0x7   :  { %p495_p4 = pnand %p494_p3, %p488_p0 }
   0x9   :  { %498 = shalt.err (!%p495_p4)
}
   0xa   :  { %s502_s15 = smov 128   ;;  %s503_s16 = smov 8  }
   0xb   :  { %22 = dma.hbm_to_vmem [thread:$0]  %s599_s1, 6144, %s17_s13, [#allocation3], %s502_s15, %s502_s15, %s503_s16  }
   0xc   :  { %499 = dma.done.wait [#allocation3], 6144  }
   0xd   :  { %500 = vsyncadd [#allocation3], 4294961152  ;;  %v504_v0 = vmov 0.0   ;;  %vm505_vm0 = vmmov 0   ;;  %v47_v1 = vld [vmem:[#allocation2 + $0x78] sm:$0xff]  ;;  %v46_v2 = vld [vmem:[#allocation2 + $0x70] sm:$0xff] }
   0xe   :  { %367 = vmatprep.subr.mxu0 %v504_v0  ;;  %399 = vmatprep.mubr.msk.f32.mxu0 %vm505_vm0, %v504_v0  ;;  %v45_v3 = vld [vmem:[#allocation2 + $0x68] sm:$0xff]  ;;  %v44_v4 = vld [vmem:[#allocation2 + $0x60] sm:$0xff]  ;;  %v139_v5 = vld [vmem:[#allocation2 + $0xf8] sm:$0xff] }
   0xf   :  { %402 = vmatprep.subr.mxu1 %v504_v0  ;;  %434 = vmatprep.mubr.msk.f32.mxu1 %vm505_vm0, %v504_v0  ;;  %v43_v6 = vld [vmem:[#allocation2 + $0x58] sm:$0xff]  ;;  %v138_v7 = vld [vmem:[#allocation2 + $0xf0] sm:$0xff]  ;;  %v137_v8 = vld [vmem:[#allocation2 + $0xe8] sm:$0xff] }
  0x10   :  { %368 = vmatpush3.msra.mxu0 %v47_v1  ;;  %403 = vmatpush3.msra.mxu1 %v139_v5  ;;  %v42_v9 = vld [vmem:[#allocation2 + $0x50] sm:$0xff]  ;;  %v136_v10 = vld [vmem:[#allocation2 + $0xe0] sm:$0xff]  ;;  %v41_v11 = vld [vmem:[#allocation2 + $0x48] sm:$0xff] }
  0x11   :  { %369 = vmatprep.subr.mxu0 %v504_v0  ;;  %404 = vmatprep.subr.mxu1 %v504_v0  ;;  %v135_v12 = vld [vmem:[#allocation2 + $0xd8] sm:$0xff]  ;;  %v40_v13 = vld [vmem:[#allocation2 + $0x40] sm:$0xff]  ;;  %v134_v14 = vld [vmem:[#allocation2 + $0xd0] sm:$0xff] }
  0x12   :  { %370 = vmatpush3.msra.mxu0 %v46_v2  ;;  %405 = vmatpush3.msra.mxu1 %v138_v7  ;;  %v39_v15 = vld [vmem:[#allocation2 + $0x38] sm:$0xff]  ;;  %v133_v16 = vld [vmem:[#allocation2 + $0xc8] sm:$0xff]  ;;  %v38_v17 = vld [vmem:[#allocation2 + $0x30] sm:$0xff] }
  0x13   :  { %371 = vmatprep.subr.mxu0 %v504_v0  ;;  %406 = vmatprep.subr.mxu1 %v504_v0  ;;  %v132_v18 = vld [vmem:[#allocation2 + $0xc0] sm:$0xff]  ;;  %v37_v19 = vld [vmem:[#allocation2 + $0x28] sm:$0xff]  ;;  %v131_v20 = vld [vmem:[#allocation2 + $0xb8] sm:$0xff] }
  0x14   :  { %372 = vmatpush3.msra.mxu0 %v45_v3  ;;  %407 = vmatpush3.msra.mxu1 %v137_v8  ;;  %v36_v21 = vld [vmem:[#allocation2 + $0x20] sm:$0xff]  ;;  %v130_v22 = vld [vmem:[#allocation2 + $0xb0] sm:$0xff]  ;;  %v35_v23 = vld [vmem:[#allocation2 + $0x18] sm:$0xff] }
  0x15   :  { %373 = vmatprep.subr.mxu0 %v504_v0  ;;  %408 = vmatprep.subr.mxu1 %v504_v0  ;;  %v129_v24 = vld [vmem:[#allocation2 + $0xa8] sm:$0xff]  ;;  %v34_v25 = vld [vmem:[#allocation2 + $0x10] sm:$0xff]  ;;  %v128_v26 = vld [vmem:[#allocation2 + $0xa0] sm:$0xff] }
  0x16   :  { %374 = vmatpush3.msra.mxu0 %v44_v4  ;;  %409 = vmatpush3.msra.mxu1 %v136_v10  ;;  %v33_v27 = vld [vmem:[#allocation2 + $0x8] sm:$0xff]  ;;  %v127_v28 = vld [vmem:[#allocation2 + $0x98] sm:$0xff]  ;;  %v32_v29 = vld [vmem:[#allocation2] sm:$0xff] }
  0x17   :  { %375 = vmatprep.subr.mxu0 %v504_v0  ;;  %410 = vmatprep.subr.mxu1 %v504_v0  ;;  %v28_v30 = vld [vmem:[%s598_s0] sm:$0xff]  ;;  %v126_v31 = vld [vmem:[#allocation2 + $0x90] sm:$0xff]  ;;  %v125_v32 = vld [vmem:[#allocation2 + $0x88] sm:$0xff] }
  0x18   :  { %376 = vmatpush3.msra.mxu0 %v43_v6  ;;  %411 = vmatpush3.msra.mxu1 %v135_v12  ;;  %v124_v33 = vld [vmem:[#allocation2 + $0x80] sm:$0xff]  ;;  %v231_v34 = vld [vmem:[#allocation2 + $0x178] sm:$0xff]  ;;  %v230_v35 = vld [vmem:[#allocation2 + $0x170] sm:$0xff] }
  0x19   :  { %377 = vmatprep.subr.mxu0 %v504_v0  ;;  %412 = vmatprep.subr.mxu1 %v504_v0  ;;  %v229_v36 = vld [vmem:[#allocation2 + $0x168] sm:$0xff]  ;;  %v228_v37 = vld [vmem:[#allocation2 + $0x160] sm:$0xff]  ;;  %v227_v38 = vld [vmem:[#allocation2 + $0x158] sm:$0xff] }
  0x1a   :  { %378 = vmatpush3.msra.mxu0 %v42_v9  ;;  %413 = vmatpush3.msra.mxu1 %v134_v14  ;;  %v226_v39 = vld [vmem:[#allocation2 + $0x150] sm:$0xff]  ;;  %v225_v40 = vld [vmem:[#allocation2 + $0x148] sm:$0xff]  ;;  %v224_v41 = vld [vmem:[#allocation2 + $0x140] sm:$0xff] }
  0x1b   :  { %379 = vmatprep.subr.mxu0 %v504_v0  ;;  %414 = vmatprep.subr.mxu1 %v504_v0  ;;  %v223_v42 = vld [vmem:[#allocation2 + $0x138] sm:$0xff]  ;;  %v222_v43 = vld [vmem:[#allocation2 + $0x130] sm:$0xff]  ;;  %v221_v44 = vld [vmem:[#allocation2 + $0x128] sm:$0xff] }
  0x1c   :  { %380 = vmatpush3.msra.mxu0 %v41_v11  ;;  %415 = vmatpush3.msra.mxu1 %v133_v16  ;;  %v220_v45 = vld [vmem:[#allocation2 + $0x120] sm:$0xff]  ;;  %v219_v46 = vld [vmem:[#allocation2 + $0x118] sm:$0xff]  ;;  %v218_v52 = vld [vmem:[#allocation2 + $0x110] sm:$0xff] }
  0x1d   :  { %381 = vmatprep.subr.mxu0 %v504_v0  ;;  %416 = vmatprep.subr.mxu1 %v504_v0  ;;  %v313_v47 = vld [vmem:[%s600_s2] ss:$0 sm:$0xff]  ;;  %v217_v53 = vld [vmem:[#allocation2 + $0x108] sm:$0xff]  ;;  %v314_v55 = vld [vmem:[%s600_s2 + $0x1] ss:$0 sm:$0xff] }
  0x1e   :  { %382 = vmatpush3.msra.mxu0 %v40_v13  ;;  %417 = vmatpush3.msra.mxu1 %v132_v18  ;;  %v216_v54 = vld [vmem:[#allocation2 + $0x100] sm:$0xff] }
  0x1f   :  { %383 = vmatprep.subr.mxu0 %v504_v0  ;;  %418 = vmatprep.subr.mxu1 %v504_v0  ;;  %v315_v60 = vld [vmem:[%s600_s2 + $0x2] ss:$0 sm:$0xff] }
  0x20   :  { %384 = vmatpush3.msra.mxu0 %v39_v15  ;;  %419 = vmatpush3.msra.mxu1 %v131_v20 }
  0x21   :  { %385 = vmatprep.subr.mxu0 %v504_v0  ;;  %420 = vmatprep.subr.mxu1 %v504_v0 }
  0x22   :  { %386 = vmatpush3.msra.mxu0 %v38_v17  ;;  %421 = vmatpush3.msra.mxu1 %v130_v22 }
  0x23   :  { %387 = vmatprep.subr.mxu0 %v504_v0  ;;  %422 = vmatprep.subr.mxu1 %v504_v0 }
  0x24   :  { %388 = vmatpush3.msra.mxu0 %v37_v19  ;;  %423 = vmatpush3.msra.mxu1 %v129_v24 }
  0x25   :  { %389 = vmatprep.subr.mxu0 %v504_v0  ;;  %424 = vmatprep.subr.mxu1 %v504_v0 }
  0x26   :  { %390 = vmatpush3.msra.mxu0 %v36_v21  ;;  %425 = vmatpush3.msra.mxu1 %v128_v26 }
  0x27   :  { %391 = vmatprep.subr.mxu0 %v504_v0  ;;  %426 = vmatprep.subr.mxu1 %v504_v0 }
  0x28   :  { %392 = vmatpush3.msra.mxu0 %v35_v23  ;;  %427 = vmatpush3.msra.mxu1 %v127_v28 }
  0x29   :  { %393 = vmatprep.subr.mxu0 %v504_v0  ;;  %428 = vmatprep.subr.mxu1 %v504_v0 }
  0x2a   :  { %394 = vmatpush3.msra.mxu0 %v34_v25  ;;  %429 = vmatpush3.msra.mxu1 %v126_v31 }
  0x2b   :  { %395 = vmatprep.subr.mxu0 %v504_v0  ;;  %430 = vmatprep.subr.mxu1 %v504_v0 }
  0x2c   :  { %396 = vmatpush3.msra.mxu0 %v33_v27  ;;  %431 = vmatpush3.msra.mxu1 %v125_v32 }
  0x2d   :  { %397 = vmatprep.subr.mxu0 %v504_v0  ;;  %432 = vmatprep.subr.mxu1 %v504_v0 }
  0x2e   :  { %398 = vmatpush3.msra.mxu0 %v32_v29  ;;  %433 = vmatpush3.msra.mxu1 %v124_v33 }
  0x2f   :  { %400 = vmatmul.mubr.f32.vlgmr.msra.gmra.mxu0 %v28_v30  ;;  %437 = vmatprep.subr.mxu0 %v504_v0 }
  0x30   :  { %469 = vmatprep.mubr.msk.f32.mxu0 %vm505_vm0, %v504_v0  ;;  %438 = vmatpush3.msra.mxu0 %v231_v34 }
  0x31   :  { %439 = vmatprep.subr.mxu0 %v504_v0 }
  0x32   :  { %440 = vmatpush3.msra.mxu0 %v230_v35 }
  0x33   :  { %441 = vmatprep.subr.mxu0 %v504_v0 }
  0x34   :  { %442 = vmatpush3.msra.mxu0 %v229_v36 }
  0x35   :  { %443 = vmatprep.subr.mxu0 %v504_v0 }
  0x36   :  { %444 = vmatpush3.msra.mxu0 %v228_v37 }
  0x37   :  { %445 = vmatprep.subr.mxu0 %v504_v0 }
  0x38   :  { %446 = vmatpush3.msra.mxu0 %v227_v38 }
  0x39   :  { %447 = vmatprep.subr.mxu0 %v504_v0 }
  0x3a   :  { %448 = vmatpush3.msra.mxu0 %v226_v39 }
  0x3b   :  { %449 = vmatprep.subr.mxu0 %v504_v0 }
  0x3c   :  { %450 = vmatpush3.msra.mxu0 %v225_v40 }
  0x3d   :  { %451 = vmatprep.subr.mxu0 %v504_v0 }
  0x3e   :  { %452 = vmatpush3.msra.mxu0 %v224_v41 }
  0x3f   :  { %453 = vmatprep.subr.mxu0 %v504_v0 }
  0x40   :  { %454 = vmatpush3.msra.mxu0 %v223_v42 }
  0x41   :  { %455 = vmatprep.subr.mxu0 %v504_v0 }
  0x42   :  { %456 = vmatpush3.msra.mxu0 %v222_v43 }
  0x43   :  { %457 = vmatprep.subr.mxu0 %v504_v0 }
  0x44   :  { %458 = vmatpush3.msra.mxu0 %v221_v44 }
  0x45   :  { %459 = vmatprep.subr.mxu0 %v504_v0 }
  0x46   :  { %460 = vmatpush3.msra.mxu0 %v220_v45 }
  0x47   :  { %461 = vmatprep.subr.mxu0 %v504_v0 }
  0x48   :  { %462 = vmatpush3.msra.mxu0 %v219_v46 }
  0x49   :  { %463 = vmatprep.subr.mxu0 %v504_v0 }
  0x4a   :  { %464 = vmatpush3.msra.mxu0 %v218_v52 }
  0x4b   :  { %465 = vmatprep.subr.mxu0 %v504_v0 }
  0x4c   :  { %466 = vmatpush3.msra.mxu0 %v217_v53 }
  0x4d   :  { %467 = vmatprep.subr.mxu0 %v504_v0 }
  0x4e   :  { %468 = vmatpush3.msra.mxu0 %v216_v54 }
  0xef   :  { %v118_v48 = vpop.f32.mrf.mxu0 }
  0xf0   :  { %v119_v49 = vadd.f32 %v313_v47, %v118_v48 }
  0xf1   :  { %v401_v50 = vpop.f32.mrf.mxu0 }
  0xf2   :  { %v122_v51 = vmax.f32 %v119_v49, 0.0 }
  0xf4   :  { %435 = vmatmul.mubr.f32.vlgmr.msra.gmra.mxu1 %v122_v51 }
 0x1b4   :  { %v210_v56 = vpop.f32.mrf.mxu1 }
 0x1b5   :  { %v211_v57 = vadd.f32 %v314_v55, %v210_v56 }
 0x1b6   :  { %v436_v58 = vpop.f32.mrf.mxu1 }
 0x1b7   :  { %v214_v59 = vmax.f32 %v211_v57, 0.0 }
 0x1b9   :  { %470 = vmatmul.mubr.f32.vlgmr.msra.gmra.mxu0 %v214_v59 }
 0x279   :  { %v302_v61 = vpop.f32.mrf.mxu0 }
 0x27a   :  { %v303_v62 = vadd.f32 %v315_v60, %v302_v61 }
 0x27b   :  { %v471_v63 = vpop.f32.mrf.mxu0 }
 0x27c   :  { %477 = vtanh.f32 %v303_v62 }
 0x289   :  { %v478_v0 = vpop.eup %477 }
 0x28a   :  { %307 = vst [vmem:[%s601_s3] sm:$0xff] %v478_v0 }
 0x28b   :  { %312 = vsyncpa [#allocation3], 1 }

</bundles_post_ra>
